<compile_context>
chip_gen: v5e
topology: v5e:2x2
jax: 0.10.0
libtpu: 0.0.40
codegen_flags: <defaults>
</compile_context>

<pallas_src>
from functools import partial

import jax
import jax.numpy as jnp
from jax.experimental import pallas as pl
from jax.experimental.pallas import tpu as pltpu


# --------------------------------------------------------------------------- #
# Pass A: block-mask expansion + global renormalisation (small, one shot)     #
# --------------------------------------------------------------------------- #
def _mask_kernel(noise_ref, keep_ref, *, gamma, block_size, H, W):
    """Produce the pre-scaled keep mask: (1 - maxpool(hit)) * (numel / sum)."""
    # noise_ref: (N, Hp, Wp), padded with a sentinel > gamma so the border never
    # triggers a drop (identical to max_pool2d zero-padding on a {0,1} mask).
    hit = (noise_ref[...] <= gamma).astype(jnp.float32)          # (N, Hp, Wp)

    # Separable max-pool, stride 1: max over dy (sublane shifts) ...
    rowmax = hit[:, 0:H, :]
    for dy in range(1, block_size):
        rowmax = jnp.maximum(rowmax, hit[:, dy:dy + H, :])       # (N, H, Wp)
    # ... then max over dx (lane shifts).
    pooled = rowmax[:, :, 0:W]
    for dx in range(1, block_size):
        pooled = jnp.maximum(pooled, rowmax[:, :, dx:dx + W])    # (N, H, W)

    keep = 1.0 - pooled                                          # 1 keep / 0 drop

    # Global renorm: mask.numel() / mask.sum() over the (N,1,H,W) mask,
    # folded into the mask so the apply pass is a single vmul per element.
    total = jnp.float32(keep.size)
    s = jnp.sum(keep)
    scale = jnp.where(s > 0, total / s, jnp.float32(0.0))        # avoid NaN if all dropped
    keep_ref[...] = keep * scale


# --------------------------------------------------------------------------- #
# Pass B: tiled, lane-dense, pipelined elementwise apply                      #
# --------------------------------------------------------------------------- #
def _apply_kernel(x_ref, m_ref, o_ref):
    # x_ref: (1, Ct, HW), m_ref: (1, 1, HW)  -> broadcast over the channel chunk.
    o_ref[...] = x_ref[...] * m_ref[...]


def dropblock2d(x, key, p=0.1, block_size=7, training=True):
    """Functional DropBlock2d matching holocron.nn.functional.dropblock2d."""
    if (not training) or p == 0.0:
        return x

    N, C, H, W = x.shape
    gamma = p / (block_size ** 2)          # == DropBlock2d.drop_prob
    pad = block_size // 2
    # TODO(synk): alignment matches PyTorch max_pool2d(k, stride=1, pad=k//2)
    # only for odd block_size (the reference default of 7 is odd).

    # Block-centre noise, padded with a sentinel (> gamma, since gamma <= 1) so
    # the shifted max never drops outside the image.
    # TODO(synk): could generate in-kernel with pltpu.prng_* to skip this small
    # HBM round-trip; kept host-side for simplicity.
    noise = jax.random.uniform(key, (N, H, W), dtype=jnp.float32)
    noise = jnp.pad(noise, ((0, 0), (pad, pad), (pad, pad)), constant_values=2.0)
    Hp, Wp = H + 2 * pad, W + 2 * pad

    mask_kernel = partial(_mask_kernel, gamma=gamma, block_size=block_size, H=H, W=W)
    keep_scaled = pl.pallas_call(
        mask_kernel,
        out_shape=jax.ShapeDtypeStruct((N, H, W), jnp.float32),
        grid=(1,),
        in_specs=[pl.BlockSpec((N, Hp, Wp), lambda i: (0, 0, 0))],
        out_specs=pl.BlockSpec((N, H, W), lambda i: (0, 0, 0)),
        compiler_params=pltpu.CompilerParams(dimension_semantics=("arbitrary",)),
    )(noise)

    # Lane-dense layout for the heavy apply pass: (N, C, H*W); free reshapes.
    HW = H * W
    x3 = x.reshape(N, C, HW)
    mask = keep_scaled.reshape(N, 1, HW).astype(x.dtype)   # pre-scaled, x-dtype

    # Channel-chunk so one (1, Ct, HW) tile is ~<= 2 MiB; double-buffered
    # (x + out) + mask stays far below even v7x's 64 MiB VMEM.
    itemsize = jnp.dtype(x.dtype).itemsize
    target_bytes = 2 * 1024 * 1024
    ct = min(C, max(1, target_bytes // max(1, HW * itemsize)))
    if ct < C:
        ct = min(C, max(8, (ct // 8) * 8))   # keep (8,128) block constraint happy
    n_cb = pl.cdiv(C, ct)

    y3 = pl.pallas_call(
        _apply_kernel,
        out_shape=jax.ShapeDtypeStruct((N, C, HW), x.dtype),
        grid=(N, n_cb),                       # c innermost -> mask block reused per n
        in_specs=[
            pl.BlockSpec((1, ct, HW), lambda n, c: (n, c, 0)),
            pl.BlockSpec((1, 1, HW), lambda n, c: (n, 0, 0)),
        ],
        out_specs=pl.BlockSpec((1, ct, HW), lambda n, c: (n, c, 0)),
        compiler_params=pltpu.CompilerParams(
            dimension_semantics=("parallel", "parallel")),
    )(x3, mask)

    return y3.reshape(N, C, H, W)


class DropBlock2d:
    """Thin module-style wrapper mirroring the PyTorch class."""

    def __init__(self, p=0.1, block_size=7, inplace=False):
        self.p = p
        self.block_size = block_size
        self.inplace = inplace  # no-op in JAX (functional); kept for parity
        self.training = True

    @property
    def drop_prob(self):
        return self.p / self.block_size ** 2

    def __call__(self, x, key):
        return dropblock2d(x, key, p=self.p, block_size=self.block_size,
                           training=self.training)


if __name__ == "__main__":
    key = jax.random.PRNGKey(0)
    kx, kn = jax.random.split(key)

    x = jax.random.normal(kx, (2, 4, 16, 16), dtype=jnp.float32)

    mod = DropBlock2d(p=0.1, block_size=7)
    y = mod(x, kn)
    y = jax.block_until_ready(y)

    assert y.shape == x.shape and y.dtype == x.dtype
    assert bool(jnp.all(jnp.isfinite(y)))
    # kept positions are a rescaled copy of x; dropped positions are exactly 0
    assert bool(jnp.all((y == 0) | (jnp.sign(y) == jnp.sign(x))))

    print("KERNEL_OK")
</pallas_src>

<mosaic_0001>
module attributes {stable_mosaic.version = 11 : i64} {
  func.func @_mask_kernel(%arg0: i32, %arg1: memref<2x22x22xf32, #tpu.memory_space<vmem>>, %arg2: memref<2x16x16xf32, #tpu.memory_space<vmem>>) attributes {dimension_semantics = [#tpu.dimension_semantics<arbitrary>], iteration_bounds = array<i64: 1>, scalar_prefetch = 0 : i64, scratch_operands = 0 : i64, tpu.core_type = #tpu.core_type<tc>, window_params = [{pipeline_mode = #tpu.pipeline_mode<synchronous>, transform_indices = @transform_0, window_bounds = array<i64: 2, 22, 22>}, {pipeline_mode = #tpu.pipeline_mode<synchronous>, transform_indices = @transform_1, window_bounds = array<i64: 2, 16, 16>}]} {
    %c0 = arith.constant 0 : index
    %c0_0 = arith.constant 0 : index
    %c0_1 = arith.constant 0 : index
    %0 = vector.load %arg1[%c0, %c0_0, %c0_1] : memref<2x22x22xf32, #tpu.memory_space<vmem>>, vector<2x22x22xf32>
    %cst = arith.constant 0.00204081624 : f32
    %1 = vector.broadcast %cst : f32 to vector<2x22x22xf32>
    %2 = arith.cmpf ole, %0, %1 : vector<2x22x22xf32>
    %3 = arith.extui %2 : vector<2x22x22xi1> to vector<2x22x22xi32>
    %4 = arith.sitofp %3 : vector<2x22x22xi32> to vector<2x22x22xf32>
    %5 = vector.extract_strided_slice %4 {offsets = [0, 0, 0], sizes = [2, 16, 22], strides = [1, 1, 1]} : vector<2x22x22xf32> to vector<2x16x22xf32>
    %6 = vector.extract_strided_slice %4 {offsets = [0, 1, 0], sizes = [2, 16, 22], strides = [1, 1, 1]} : vector<2x22x22xf32> to vector<2x16x22xf32>
    %7 = arith.maximumf %5, %6 : vector<2x16x22xf32>
    %8 = vector.extract_strided_slice %4 {offsets = [0, 2, 0], sizes = [2, 16, 22], strides = [1, 1, 1]} : vector<2x22x22xf32> to vector<2x16x22xf32>
    %9 = arith.maximumf %7, %8 : vector<2x16x22xf32>
    %10 = vector.extract_strided_slice %4 {offsets = [0, 3, 0], sizes = [2, 16, 22], strides = [1, 1, 1]} : vector<2x22x22xf32> to vector<2x16x22xf32>
    %11 = arith.maximumf %9, %10 : vector<2x16x22xf32>
    %12 = vector.extract_strided_slice %4 {offsets = [0, 4, 0], sizes = [2, 16, 22], strides = [1, 1, 1]} : vector<2x22x22xf32> to vector<2x16x22xf32>
    %13 = arith.maximumf %11, %12 : vector<2x16x22xf32>
    %14 = vector.extract_strided_slice %4 {offsets = [0, 5, 0], sizes = [2, 16, 22], strides = [1, 1, 1]} : vector<2x22x22xf32> to vector<2x16x22xf32>
    %15 = arith.maximumf %13, %14 : vector<2x16x22xf32>
    %16 = vector.extract_strided_slice %4 {offsets = [0, 6, 0], sizes = [2, 16, 22], strides = [1, 1, 1]} : vector<2x22x22xf32> to vector<2x16x22xf32>
    %17 = arith.maximumf %15, %16 : vector<2x16x22xf32>
    %18 = vector.extract_strided_slice %17 {offsets = [0, 0, 0], sizes = [2, 16, 16], strides = [1, 1, 1]} : vector<2x16x22xf32> to vector<2x16x16xf32>
    %19 = vector.extract_strided_slice %17 {offsets = [0, 0, 1], sizes = [2, 16, 16], strides = [1, 1, 1]} : vector<2x16x22xf32> to vector<2x16x16xf32>
    %20 = arith.maximumf %18, %19 : vector<2x16x16xf32>
    %21 = vector.extract_strided_slice %17 {offsets = [0, 0, 2], sizes = [2, 16, 16], strides = [1, 1, 1]} : vector<2x16x22xf32> to vector<2x16x16xf32>
    %22 = arith.maximumf %20, %21 : vector<2x16x16xf32>
    %23 = vector.extract_strided_slice %17 {offsets = [0, 0, 3], sizes = [2, 16, 16], strides = [1, 1, 1]} : vector<2x16x22xf32> to vector<2x16x16xf32>
    %24 = arith.maximumf %22, %23 : vector<2x16x16xf32>
    %25 = vector.extract_strided_slice %17 {offsets = [0, 0, 4], sizes = [2, 16, 16], strides = [1, 1, 1]} : vector<2x16x22xf32> to vector<2x16x16xf32>
    %26 = arith.maximumf %24, %25 : vector<2x16x16xf32>
    %27 = vector.extract_strided_slice %17 {offsets = [0, 0, 5], sizes = [2, 16, 16], strides = [1, 1, 1]} : vector<2x16x22xf32> to vector<2x16x16xf32>
    %28 = arith.maximumf %26, %27 : vector<2x16x16xf32>
    %29 = vector.extract_strided_slice %17 {offsets = [0, 0, 6], sizes = [2, 16, 16], strides = [1, 1, 1]} : vector<2x16x22xf32> to vector<2x16x16xf32>
    %30 = arith.maximumf %28, %29 : vector<2x16x16xf32>
    %cst_2 = arith.constant 1.000000e+00 : f32
    %31 = vector.broadcast %cst_2 : f32 to vector<2x16x16xf32>
    %32 = arith.subf %31, %30 : vector<2x16x16xf32>
    %33 = vector.shape_cast %32 : vector<2x16x16xf32> to vector<1x2x16x16xf32>
    %cst_3 = arith.constant dense<0.000000e+00> : vector<1xf32>
    %34 = vector.multi_reduction <add>, %33, %cst_3 [1, 2, 3] : vector<1x2x16x16xf32> to vector<1xf32>
    %35 = vector.shape_cast %34 : vector<1xf32> to vector<1x1x1x1xf32>
    %36 = vector.extract %35[0, 0, 0, 0] : f32 from vector<1x1x1x1xf32>
    %cst_4 = arith.constant 0.000000e+00 : f32
    %37 = arith.cmpf ogt, %36, %cst_4 : f32
    %cst_5 = arith.constant 5.120000e+02 : f32
    %38 = arith.divf %cst_5, %36 : f32
    %cst_6 = arith.constant 0.000000e+00 : f32
    %39 = arith.select %37, %38, %cst_6 : f32
    %40 = vector.broadcast %39 : f32 to vector<2x16x16xf32>
    %41 = arith.mulf %32, %40 : vector<2x16x16xf32>
    %c0_7 = arith.constant 0 : index
    %c0_8 = arith.constant 0 : index
    %c0_9 = arith.constant 0 : index
    %42 = vector.load %arg2[%c0_7, %c0_8, %c0_9] : memref<2x16x16xf32, #tpu.memory_space<vmem>>, vector<2x16x16xf32>
    tpu.vector_store %arg2[%c0_7, %c0_8, %c0_9], %41 {strides = array<i32>} : memref<2x16x16xf32, #tpu.memory_space<vmem>>, vector<2x16x16xf32>,
    return
  }
  func.func @transform_0(%arg0: i32) -> (i32, i32, i32) {
    %c0_i32 = arith.constant 0 : i32
    %c0_i32_0 = arith.constant 0 : i32
    %c0_i32_1 = arith.constant 0 : i32
    %c0_i32_2 = arith.constant 0 : i32
    return %c0_i32, %c0_i32_0, %c0_i32_1 : i32, i32, i32
  }
  func.func @transform_1(%arg0: i32) -> (i32, i32, i32) {
    %c0_i32 = arith.constant 0 : i32
    %c0_i32_0 = arith.constant 0 : i32
    %c0_i32_1 = arith.constant 0 : i32
    %c0_i32_2 = arith.constant 0 : i32
    return %c0_i32, %c0_i32_0, %c0_i32_1 : i32, i32, i32
  }
}

</mosaic_0001>

<bundles_post_ra>
// kernel: tpu_custom_call.1
= control target key start
LH: loop header
LB: loop body
LE: loop exit
PB: predicated region body
PF: predicated region fallthrough
CT: control target
= control target key end

     0   :  { %vm39_vm0 = vcmask 1046528   ;;  %v428_v3 = vmov 0.0   ;;  %vm58_vm4 = vcmask 1045504   ;;  %vm77_vm5 = vcmask 1044480   ;;  %s513_s0 = inlined_call_operand.vmem [shape: f32[2,22,22], index: 0, kind: input, shape index: {}]   ;;  %s514_s1 = inlined_call_operand.hbm [shape: f32[2,16,16], index: 1, kind: output, shape index: {}]  }
   0x1   :  { %v9_v0 = vld [vmem:[%s513_s0] sm:$0xff]  ;;  %v10_v1 = vld [vmem:[%s513_s0 + $0x8] sm:$0xff]  ;;  %v11_v2 = vld [vmem:[%s513_s0 + $0x10] sm:$0x3f] }
   0x2   :  { %vm15_vm1 = vcmp.le.f32.partialorder %v9_v0, 0.0020408162  ;;  %vm16_vm2 = vcmp.le.f32.partialorder %v10_v1, 0.0020408162  ;;  %vm17_vm3 = vcmp.le.f32.partialorder %v11_v2, 0.0020408162 }
   0x3   :  { %v320_v4 = vsel %vm15_vm1, 1.0, %v428_v3  ;;  %v321_v5 = vsel %vm16_vm2, 1.0, %v428_v3  ;;  %v322_v6 = vsel %vm17_vm3, 1.0, %v428_v3 }
   0x4   :  { %v40_v7 = vrot.slane %v320_v4, 1  ;;  %v41_v8 = vrot.slane %v321_v5, 1  ;;  %v43_v9 = vrot.slane %v322_v6, 1  ;;  %v59_v10 = vrot.slane %v320_v4, 2 }
   0x5   :  { %v60_v11 = vrot.slane %v321_v5, 2  ;;  %v62_v12 = vrot.slane %v322_v6, 2  ;;  %v78_v13 = vrot.slane %v320_v4, 3  ;;  %v79_v16 = vrot.slane %v321_v5, 3 }
   0x6   :  { %v42_v14 = vsel %vm39_vm0, %v40_v7, %v41_v8  ;;  %v44_v15 = vsel %vm39_vm0, %v41_v8, %v43_v9  ;;  %v81_v17 = vrot.slane %v322_v6, 3 }
   0x7   :  { %6 = vsyncpa [#allocation3], 0  ;;  %v54_v18 = vmax.f32 %v320_v4, %v42_v14  ;;  %v55_v19 = vmax.f32 %v321_v5, %v44_v15  ;;  %v61_v20 = vsel %vm58_vm4, %v59_v10, %v60_v11  ;;  %v63_v21 = vsel %vm58_vm4, %v60_v11, %v62_v12  ;;  %v12_v36 = vld [vmem:[%s513_s0 + $0x18] sm:$0xff]  ;;  %v13_v37 = vld [vmem:[%s513_s0 + $0x20] sm:$0xff]  ;;  %s430_s18 = smov 127   ;;  %s431_s19 = smov 125  }
   0x8   :  { %v80_v22 = vsel %vm77_vm5, %v78_v13, %v79_v16  ;;  %v82_v23 = vsel %vm77_vm5, %v79_v16, %v81_v17  ;;  %vm96_vm6 = vcmask 1043456   ;;  %v97_v24 = vrot.slane %v320_v4, 4  ;;  %v14_v38 = vld [vmem:[%s513_s0 + $0x28] sm:$0x3f]  ;;  %s429_s0 = smov 126   ;;  %s432_s20 = smov 124  }
   0x9   :  { %v73_v25 = vmax.f32 %v54_v18, %v61_v20  ;;  %v74_v26 = vmax.f32 %v55_v19, %v63_v21  ;;  %v98_v27 = vrot.slane %v321_v5, 4  ;;  %v100_v28 = vrot.slane %v322_v6, 4  ;;  %s433_s21 = smov 123   ;;  %s434_s22 = smov 122  }
   0xa   :  { %vm115_vm7 = vcmask 1042432   ;;  %v116_v29 = vrot.slane %v320_v4, 5  ;;  %v117_v30 = vrot.slane %v321_v5, 5  ;;  %v119_v31 = vrot.slane %v322_v6, 5  ;;  %s435_s26 = smov [#allocation2]   ;;  %s308_s30 = sshll.u32 %s514_s1, 4  ;;  %s309_s30 = int_to_ptr.hbm [resolvable:$true] %s308_s30 }
   0xb   :  { %v92_v32 = vmax.f32 %v73_v25, %v80_v22  ;;  %v93_v33 = vmax.f32 %v74_v26, %v82_v23  ;;  %v99_v34 = vsel %vm96_vm6, %v97_v24, %v98_v27  ;;  %v101_v35 = vsel %vm96_vm6, %v98_v27, %v100_v28  ;;  %s306_s27 = sshll.u32 %s435_s26, 4  ;;  %s436_s2 = smov 128   ;;  %s307_s27 = int_to_ptr.vmem [resolvable:$true] %s306_s27 }
   0xc   :  { %v118_v39 = vsel %vm115_vm7, %v116_v29, %v117_v30  ;;  %v120_v40 = vsel %vm115_vm7, %v117_v30, %v119_v31  ;;  %vm134_vm8 = vcmask 1041408   ;;  %v135_v41 = vrot.slane %v320_v4, 6  ;;  %s437_s3 = smov 8  }
   0xd   :  { %v111_v42 = vmax.f32 %v92_v32, %v99_v34  ;;  %v112_v43 = vmax.f32 %v93_v33, %v101_v35  ;;  %v136_v44 = vrot.slane %v321_v5, 6  ;;  %v138_v45 = vrot.slane %v322_v6, 6 }
   0xe   :  { %vm18_vm9 = vcmp.le.f32.partialorder %v12_v36, 0.0020408162  ;;  %vm19_vm10 = vcmp.le.f32.partialorder %v13_v37, 0.0020408162  ;;  %vm20_vm11 = vcmp.le.f32.partialorder %v14_v38, 0.0020408162 }
   0xf   :  { %v130_v46 = vmax.f32 %v111_v42, %v118_v39  ;;  %v131_v47 = vmax.f32 %v112_v43, %v120_v40  ;;  %v137_v48 = vsel %vm134_vm8, %v135_v41, %v136_v44  ;;  %v139_v49 = vsel %vm134_vm8, %v136_v44, %v138_v45 }
  0x10   :  { %v323_v50 = vsel %vm18_vm9, 1.0, %v428_v3  ;;  %v324_v51 = vsel %vm19_vm10, 1.0, %v428_v3  ;;  %v325_v52 = vsel %vm20_vm11, 1.0, %v428_v3  ;;  %vm257_vm12 = vcmask 130048  }
  0x11   :  { %v478_v53 = vmax.f32 %v130_v46, %v137_v48  ;;  %v480_v54 = vmax.f32 %v131_v47, %v139_v49  ;;  %v45_v55 = vrot.slane %v323_v50, 1  ;;  %v46_v56 = vrot.slane %v324_v51, 1 }
  0x12   :  { %v48_v57 = vrot.slane %v325_v52, 1  ;;  %v64_v58 = vrot.slane %v323_v50, 2  ;;  %v65_v59 = vrot.slane %v324_v51, 2  ;;  %v67_v60 = vrot.slane %v325_v52, 2 }
  0x13   :  { %v350_v61 = vpack.i.bf16 %v480_v54, %v478_v53  ;;  %v47_v62 = vsel %vm39_vm0, %v45_v55, %v46_v56  ;;  %v83_v63 = vrot.slane %v323_v50, 3  ;;  %v84_v5 = vrot.slane %v324_v51, 3 }
  0x14   :  { %v49_v0 = vsel %vm39_vm0, %v46_v56, %v48_v57  ;;  %v56_v1 = vmax.f32 %v323_v50, %v47_v62  ;;  %v66_v2 = vsel %vm58_vm4, %v64_v58, %v65_v59  ;;  %v68_v3 = vsel %vm58_vm4, %v65_v59, %v67_v60 }
  0x15   :  { %351 = vrot.lane.b32.xlu1 %v350_v61, %s429_s0  ;;  %341 = vrot.lane.b32.xlu0 %v350_v61, %s430_s18  ;;  %v57_v4 = vmax.f32 %v324_v51, %v49_v0  ;;  %v86_v6 = vrot.slane %v325_v52, 3  ;;  %v102_v7 = vrot.slane %v323_v50, 4  ;;  %v103_v9 = vrot.slane %v324_v51, 4 }
  0x16   :  { %v75_v8 = vmax.f32 %v56_v1, %v66_v2  ;;  %v105_v10 = vrot.slane %v325_v52, 4  ;;  %v121_v11 = vrot.slane %v323_v50, 5  ;;  %v85_v13 = vsel %vm77_vm5, %v83_v63, %v84_v5  ;;  %361 = vrot.lane.b32.xlu2 %v350_v61, %s431_s19 }
  0x17   :  { %v76_v12 = vmax.f32 %v57_v4, %v68_v3  ;;  %v87_v14 = vsel %vm77_vm5, %v84_v5, %v86_v6  ;;  %v122_v15 = vrot.slane %v324_v51, 5  ;;  %v104_v17 = vsel %vm96_vm6, %v102_v7, %v103_v9 }
  0x18   :  { %v94_v16 = vmax.f32 %v75_v8, %v85_v13  ;;  %v106_v18 = vsel %vm96_vm6, %v103_v9, %v105_v10  ;;  %v124_v19 = vrot.slane %v325_v52, 5  ;;  %v140_v22 = vrot.slane %v323_v50, 6 }
  0x19   :  { %v95_v20 = vmax.f32 %v76_v12, %v87_v14  ;;  %v123_v21 = vsel %vm115_vm7, %v121_v11, %v122_v15  ;;  %v141_v23 = vrot.slane %v324_v51, 6  ;;  %v143_v26 = vrot.slane %v325_v52, 6 }
  0x1a   :  { %v113_v24 = vmax.f32 %v94_v16, %v104_v17  ;;  %v125_v25 = vsel %vm115_vm7, %v122_v15, %v124_v19 }
  0x1b   :  { %v114_v27 = vmax.f32 %v95_v20, %v106_v18  ;;  %v142_v28 = vsel %vm134_vm8, %v140_v22, %v141_v23  ;;  %v144_v30 = vsel %vm134_vm8, %v141_v23, %v143_v26 }
  0x1c   :  { %v132_v29 = vmax.f32 %v113_v24, %v123_v21 }
  0x1d   :  { %v133_v31 = vmax.f32 %v114_v27, %v125_v25 }
  0x1e   :  { %v151_v32 = vmax.f32 %v132_v29, %v142_v28 }
  0x1f   :  { %v152_v33 = vmax.f32 %v133_v31, %v144_v30 }
  0x21   :  { %v355_v34 = vpack.i.bf16 %v152_v33, %v151_v32 }
  0x23   :  { %356 = vrot.lane.b32.xlu1 %v355_v34, %s429_s0  ;;  %346 = vrot.lane.b32.xlu0 %v355_v34, %s430_s18 }
  0x24   :  { %366 = vrot.lane.b32.xlu2 %v355_v34, %s431_s19 }
  0x2b   :  { %376 = vrot.lane.b32.xlu1 %v355_v34, %s432_s20  ;;  %371 = vrot.lane.b32.xlu0 %v350_v61, %s432_s20 }
  0x2c   :  { %381 = vrot.lane.b32.xlu2 %v350_v61, %s433_s21 }
  0x33   :  { %391 = vrot.lane.b32.xlu1 %v350_v61, %s434_s22  ;;  %386 = vrot.lane.b32.xlu0 %v355_v34, %s433_s21 }
  0x34   :  { %396 = vrot.lane.b32.xlu2 %v355_v34, %s434_s22 }
  0x70   :  { %v362_v35 = vpop.permute.xlu2 %361 }
  0x71   :  { %v364_v56 = vunpack.i.h.bf16 %v362_v35  ;;  %v363_v57 = vunpack.i.l.bf16 %v362_v35 }
  0x7e   :  { %v367_v38 = vpop.permute.xlu2 %366 }
  0x7f   :  { %v369_v2 = vunpack.i.h.bf16 %v367_v38  ;;  %v368_v3 = vunpack.i.l.bf16 %v367_v38 }
  0x86   :  { %v382_v47 = vpop.permute.xlu2 %381 }
  0x87   :  { %v352_v36 = vpop.permute.xlu1 %351  ;;  %v342_v37 = vpop.permute.xlu0 %341  ;;  %v384_v4 = vunpack.i.h.bf16 %v382_v47  ;;  %v383_v5 = vunpack.i.l.bf16 %v382_v47 }
  0x88   :  { %v344_v39 = vunpack.i.h.bf16 %v342_v37  ;;  %v343_v40 = vunpack.i.l.bf16 %v342_v37  ;;  %v354_v48 = vunpack.i.h.bf16 %v352_v36  ;;  %v353_v49 = vunpack.i.l.bf16 %v352_v36 }
  0x8a   :  { %v170_v43 = vmax.f32 %v480_v54, %v344_v39  ;;  %v169_v44 = vmax.f32 %v478_v53, %v343_v40 }
  0x8c   :  { %v185_v50 = vmax.f32 %v169_v44, %v353_v49  ;;  %v186_v51 = vmax.f32 %v170_v43, %v354_v48 }
  0x8e   :  { %v201_v54 = vmax.f32 %v185_v50, %v363_v57  ;;  %v202_v0 = vmax.f32 %v186_v51, %v364_v56  ;;  %v397_v10 = vpop.permute.xlu2 %396 }
  0x8f   :  { %v399_v13 = vunpack.i.h.bf16 %v397_v10  ;;  %v398_v14 = vunpack.i.l.bf16 %v397_v10 }
  0x95   :  { %v357_v41 = vpop.permute.xlu1 %356  ;;  %v347_v42 = vpop.permute.xlu0 %346 }
  0x96   :  { %v349_v45 = vunpack.i.h.bf16 %v347_v42  ;;  %v348_v46 = vunpack.i.l.bf16 %v347_v42  ;;  %v359_v58 = vunpack.i.h.bf16 %v357_v41  ;;  %v358_v59 = vunpack.i.l.bf16 %v357_v41 }
  0x98   :  { %v172_v52 = vmax.f32 %v152_v33, %v349_v45  ;;  %v171_v55 = vmax.f32 %v151_v32, %v348_v46 }
  0x9a   :  { %v187_v53 = vmax.f32 %v171_v55, %v358_v59  ;;  %v188_v1 = vmax.f32 %v172_v52, %v359_v58 }
  0x9c   :  { %v203_v11 = vmax.f32 %v187_v53, %v368_v3  ;;  %v204_v12 = vmax.f32 %v188_v1, %v369_v2 }
  0x9d   :  { %v377_v60 = vpop.permute.xlu1 %376  ;;  %v372_v61 = vpop.permute.xlu0 %371 }
  0x9e   :  { %v374_v62 = vunpack.i.h.bf16 %v372_v61  ;;  %v373_v63 = vunpack.i.l.bf16 %v372_v61  ;;  %v379_v6 = vunpack.i.h.bf16 %v377_v60  ;;  %v378_v7 = vunpack.i.l.bf16 %v377_v60 }
  0xa0   :  { %v217_v8 = vmax.f32 %v201_v54, %v373_v63  ;;  %v218_v9 = vmax.f32 %v202_v0, %v374_v62  ;;  %v219_v15 = vmax.f32 %v203_v11, %v378_v7  ;;  %v220_v16 = vmax.f32 %v204_v12, %v379_v6 }
  0xa2   :  { %v233_v17 = vmax.f32 %v217_v8, %v383_v5  ;;  %v234_v18 = vmax.f32 %v218_v9, %v384_v4 }
  0xa5   :  { %v392_v19 = vpop.permute.xlu1 %391  ;;  %v387_v20 = vpop.permute.xlu0 %386 }
  0xa6   :  { %v394_v21 = vunpack.i.h.bf16 %v392_v19  ;;  %v393_v22 = vunpack.i.l.bf16 %v392_v19  ;;  %v389_v23 = vunpack.i.h.bf16 %v387_v20  ;;  %v388_v24 = vunpack.i.l.bf16 %v387_v20 }
  0xa8   :  { %v249_v25 = vmax.f32 %v233_v17, %v393_v22  ;;  %v250_v26 = vmax.f32 %v234_v18, %v394_v21  ;;  %v235_v27 = vmax.f32 %v219_v15, %v388_v24  ;;  %v236_v28 = vmax.f32 %v220_v16, %v389_v23 }
  0xaa   :  { %v253_v29 = vsub.f32 1.0, %v249_v25  ;;  %v254_v30 = vsub.f32 1.0, %v250_v26  ;;  %v251_v31 = vmax.f32 %v235_v27, %v398_v14  ;;  %v252_v32 = vmax.f32 %v236_v28, %v399_v13 }
  0xac   :  { %v258_v33 = vsel %vm257_vm12, %v253_v29, 0.0  ;;  %v259_v34 = vsel %vm257_vm12, %v254_v30, 0.0  ;;  %v255_v35 = vsub.f32 1.0, %v251_v31  ;;  %v256_v36 = vsub.f32 1.0, %v252_v32 }
  0xad   :  { %v260_v37 = vadd.f32 %v259_v34, %v258_v33 }
  0xae   :  { %v261_v38 = vsel %vm257_vm12, %v255_v35, 0.0  ;;  %v263_v40 = vsel %vm257_vm12, %v256_v36, 0.0 }
  0xaf   :  { %v262_v39 = vadd.f32 %v261_v38, %v260_v37 }
  0xb1   :  { %v264_v41 = vadd.f32 %v263_v40, %v262_v39 }
  0xb3   :  { %265 = vadd.xlane.f32.xlu0 %v264_v41 }
 0x126   :  { %v266_v42 = vpop.xlane.xlu0 %265 }
 0x127   :  { %v267_v43 = vrot.slane %v266_v42, 4 }
 0x129   :  { %v268_v44 = vadd.f32 %v267_v43, %v266_v42 }
 0x12b   :  { %v269_v45 = vrot.slane %v268_v44, 2 }
 0x12d   :  { %v270_v46 = vadd.f32 %v269_v45, %v268_v44 }
 0x12f   :  { %v271_v47 = vrot.slane %v270_v46, 1 }
 0x131   :  { %v272_v48 = vadd.f32 %v271_v47, %v270_v46 }
 0x133   :  { %326 = vpush %v272_v48 }
 0x164   :  { %s327_s23 = spop %326 }
 0x165   :  { %v275_v49 = vstv %s327_s23  ;;  %p274_p0 = scmp.gt.f32.partialorder %s327_s23, 0.0 }
 0x166   :  { %400 = vrcp.f32 %v275_v49  ;;  %v287_v55 = vand.u32 2147483648, %v275_v49  ;;  %v285_v57 = vand.u32 2147483647, %v275_v49  ;;  %vm281_vm14 = vweird.f32 %v275_v49 }
 0x168   :  { %v288_v59 = vor.u32 1.1754944e-38, %v287_v55  ;;  %vm286_vm0 = vcmp.eq.f32.partialorder %v285_v57, 8.507059e+37 }
 0x16c   :  { %v401_v50 = vpop.eup %400 }
 0x16d   :  { %v277_v51 = vmul.f32 %v401_v50, %v275_v49  ;;  %vm282_vm13 = vweird.f32 %v401_v50 }
 0x16e   :  { %vm283_vm15 = vmor %vm281_vm14, %vm282_vm13 }
 0x16f   :  { %v278_v52 = vsub.f32 1.0, %v277_v51 }
 0x171   :  { %v279_v56 = vmul.f32 %v401_v50, %v278_v52 }
 0x173   :  { %v280_v58 = vadd.f32 %v401_v50, %v279_v56 }
 0x175   :  { %v284_v60 = vsel %vm283_vm15, %v401_v50, %v280_v58 }
 0x176   :  { %v289_v61 = vsel %vm286_vm0, %v288_v59, %v284_v60 }
 0x177   :  { %328 = vpush %v289_v61 }
 0x1a8   :  { %s329_s24 = spop %328 }
 0x1a9   :  { %s291_s25 = smul.f32 512.0, %s329_s24 }
 0x1ab   :  { %s516_s25 = smov (!%p274_p0, %s291_s25), 0.0 }
 0x1ac   :  { %v293_v62 = vstv %s516_s25 }
 0x1ad   :  { %v294_v63 = vmul.f32 %v293_v62, %v253_v29  ;;  %v295_v54 = vmul.f32 %v293_v62, %v254_v30  ;;  %v296_v0 = vmul.f32 %v293_v62, %v255_v35  ;;  %v297_v53 = vmul.f32 %v293_v62, %v256_v36 }
 0x1af   :  { %298 = vst.msk [vmem:[#allocation2] sm:$0xff] %vm257_vm12, %v294_v63 }
 0x1b0   :  { %299 = vst.msk [vmem:[#allocation2 + $0x8] sm:$0xff] %vm257_vm12, %v295_v54 }
 0x1b1   :  { %300 = vst.msk [vmem:[#allocation2 + $0x10] sm:$0xff] %vm257_vm12, %v296_v0 }
 0x1b2   :  { %301 = vst.msk [vmem:[#allocation2 + $0x18] sm:$0xff] %vm257_vm12, %v297_v53 }
 0x1b3   :  { %314 = dma.vmem_to_hbm [thread:$0]  %s307_s27, 512, %s309_s30, [#allocation3], %s436_s2, %s436_s2, %s437_s3  }
 0x1b4   :  { %426 = dma.done.wait [#allocation3], 512  }
 0x1b5   :  { %427 = vsyncadd [#allocation3], 4294966784 }
 0x1b6   :  { %319 = vsyncpa [#allocation3], 1 }

</bundles_post_ra>
